<compile_context>
chip_gen: v6e
topology: v6e:2x2x1
jax: 0.10.0
libtpu: 0.0.40
codegen_flags: <defaults>
</compile_context>

<pallas_src>
import functools
import math

import jax
import jax.numpy as jnp
from jax.experimental import pallas as pl
from jax.experimental.pallas import tpu as pltpu


def _label_smoothing_kernel(x_ref, tgt_ref, out_ref, acc_ref, *,
                            base, conf_minus_base, c0, padding_idx,
                            col_tile, vocab, mask_col_tail, single_col_tile):
    j = pl.program_id(1)

    @pl.when(j == 0)
    def _():
        acc_ref[...] = jnp.zeros_like(acc_ref)

    x = x_ref[...]                          # (row_tile, col_tile), caller dtype
    tgt = tgt_ref[...]                      # (row_tile, 1) int32
    zero = jnp.zeros((), x.dtype)

    col0 = 0 if single_col_tile else j * col_tile
    # Class ids as a (1, col_tile) row; the compare broadcasts it against the
    # (row_tile, 1) targets (no full-tile iota materialization).
    col = col0 + jax.lax.broadcasted_iota(jnp.int32, (1, col_tile), 1)

    if mask_col_tail:
        # Ragged vocab tail: zero the garbage columns so NaNs can't leak into the dots.
        x = jnp.where(col < vocab, x, zero)

    # "ones" matvec vector that already drops the padding column (and ragged tail).
    col_sub = col0 + jax.lax.broadcasted_iota(jnp.int32, (col_tile, 1), 0)
    keep = col_sub != padding_idx
    if mask_col_tail:
        keep = keep & (col_sub < vocab)
    ones_m = keep.astype(x.dtype)           # (col_tile, 1)

    # MXU matvecs (f32 accumulate): row sum over non-padding columns and the
    # target-column gather.  The VPU only does the compare + one select.
    is_tgt = col == tgt                     # (row_tile, col_tile)
    sum_x = jnp.dot(x, ones_m, preferred_element_type=jnp.float32)           # (row_tile, 1)
    x_tgt = jnp.dot(jnp.where(is_tgt, x, zero), ones_m,
                    preferred_element_type=jnp.float32)                      # (row_tile, 1)

    acc_ref[...] += (-base) * sum_x - conf_minus_base * x_tgt

    @pl.when(j == pl.num_programs(1) - 1)
    def _():
        # Rows whose target is padding_idx (including padded tail rows) contribute 0.
        valid = tgt != padding_idx
        per_row = jnp.where(valid, acc_ref[...] + c0, 0.0)
        out_ref[...] = jnp.zeros(out_ref.shape, jnp.float32) + jnp.sum(per_row)


def label_smoothing_loss(x, target, *, padding_idx, smoothing,
                         block_bytes=4 * 1024 * 1024):
    """x: (N, V) log-probs (any float dtype, used as-is); target: (N,) ints. f32 loss."""
    N, V = x.shape
    target = target.astype(jnp.int32)
    itemsize = jnp.dtype(x.dtype).itemsize

    confidence = 1.0 - smoothing
    base = smoothing / (V - 2)
    # Fold y*log(y) to Python constants; guard y == 0 (smoothing in {0, 1}).
    conf_log_conf = confidence * math.log(confidence) if confidence > 0.0 else 0.0
    base_log_base = base * math.log(base) if base > 0.0 else 0.0
    c0 = (V - 2) * base_log_base + conf_log_conf    # sum of y*log(y) over one valid row

    # --- tile sizing (VMEM aware: ~block_bytes per buffered block, so double
    #     buffering + scratch stays well below 32 MiB even on v7x's 64 MiB VMEM) ---
    tgt_row_bytes = 512                  # (row_tile, 1) i32 block is lane-padded to 128
    if N < 8:
        row_tile = N
    else:
        rows_budget = max(8, (block_bytes // (V * itemsize + tgt_row_bytes)) // 8 * 8)
        row_tile = max(8, min((N // 8) * 8, rows_budget))

    if row_tile * (V * itemsize + tgt_row_bytes) <= block_bytes or V <= 128:
        col_tile = V                      # whole vocab per block (common case)
    else:
        # Very large vocab: keep 8 (or N) rows and tile the vocab along lanes.
        col_tile = max(128, (block_bytes // (row_tile * itemsize)) // 128 * 128)
        col_tile = min(col_tile, V)

    num_row_tiles = pl.cdiv(N, row_tile)
    num_col_tiles = pl.cdiv(V, col_tile)
    mask_col_tail = (V % col_tile) != 0

    # Pad only the (tiny) target vector; padded rows carry padding_idx so they are
    # masked exactly like real padding rows.  x is never copied or padded.
    n_rows_pad = num_row_tiles * row_tile
    if n_rows_pad != N:
        target = jnp.pad(target, (0, n_rows_pad - N), constant_values=padding_idx)
    tgt2d = target.reshape(n_rows_pad, 1)

    kernel = functools.partial(
        _label_smoothing_kernel,
        base=float(base), conf_minus_base=float(confidence - base), c0=float(c0),
        padding_idx=padding_idx, col_tile=col_tile, vocab=V,
        mask_col_tail=mask_col_tail, single_col_tile=(num_col_tiles == 1),
    )

    partials = pl.pallas_call(
        kernel,
        out_shape=jax.ShapeDtypeStruct((num_row_tiles, 1, 128), jnp.float32),
        grid_spec=pltpu.PrefetchScalarGridSpec(
            num_scalar_prefetch=0,
            grid=(num_row_tiles, num_col_tiles),
            in_specs=[
                pl.BlockSpec((row_tile, col_tile), lambda i, j: (i, j)),
                # j-constant index map -> targets fetched once per row tile.
                pl.BlockSpec((row_tile, 1), lambda i, j: (i, 0)),
            ],
            # j-constant, lane-dense (1,1,128) partial-sum block per row tile.
            out_specs=pl.BlockSpec((1, 1, 128), lambda i, j: (i, 0, 0)),
            scratch_shapes=[pltpu.VMEM((row_tile, 1), jnp.float32)],
        ),
        compiler_params=pltpu.CompilerParams(
            dimension_semantics=("parallel", "arbitrary"),
            vmem_limit_bytes=32 * 1024 * 1024,
        ),
    )(x, tgt2d)
    # TODO(synk): for fully DMA-bound v7x configs, consider pipeline_mode=pl.Buffered(3) on x.
    return jnp.sum(partials[:, 0, 0])


def _reference(x, target, *, padding_idx, smoothing):
    x = x.astype(jnp.float32)
    N, V = x.shape
    confidence = 1.0 - smoothing
    base = smoothing / (V - 2)
    col = jnp.arange(V)[None, :]
    tgt = target[:, None]
    td = jnp.where(col == tgt, confidence, base)
    td = jnp.where(col == padding_idx, 0.0, td)
    td = jnp.where(tgt == padding_idx, 0.0, td)
    safe_td = jnp.where(td > 0.0, td, 1.0)
    contrib = jnp.where(td > 0.0, td * (jnp.log(safe_td) - x), 0.0)
    return jnp.sum(contrib)


if __name__ == "__main__":
    padding_idx = 0
    smoothing = 0.1

    def check(x, tgt, *, rtol=1e-5, atol=1e-5, **kw):
        loss = jax.block_until_ready(
            label_smoothing_loss(x, tgt, padding_idx=padding_idx,
                                 smoothing=smoothing, **kw))
        ref = _reference(x, tgt, padding_idx=padding_idx, smoothing=smoothing)
        assert jnp.allclose(loss, ref, rtol=rtol, atol=atol), (loss, ref)

    k1, k2, k3, k4, k5, k6 = jax.random.split(jax.random.PRNGKey(0), 6)

    # Case 1: 16 tokens, vocab 32 (single row/col tile, blocks equal full extents).
    N, V = 16, 32
    x1 = jax.nn.log_softmax(jax.random.normal(k1, (N, V), jnp.float32), axis=-1)
    t1 = jax.random.randint(k2, (N,), 0, V, dtype=jnp.int32)
    t1 = t1.at[3].set(padding_idx).at[9].set(padding_idx)
    check(x1, t1)

    # Case 2: 13 tokens (ragged row tail masked via padded targets; 2 parallel row tiles).
    N2 = 13
    x2 = jax.nn.log_softmax(jax.random.normal(k3, (N2, V), jnp.float32), axis=-1)
    t2 = jax.random.randint(k4, (N2,), 0, V, dtype=jnp.int32).at[5].set(padding_idx)
    check(x2, t2)

    # Case 3: bfloat16 log-probs consumed directly (no wrapper upcast; f32 MXU accumulate).
    check(x1.astype(jnp.bfloat16), t1, rtol=5e-3, atol=5e-3)

    # Case 4: vocab-tiling path (V=200 split into 128-wide lane tiles, ragged tail masked).
    N4, V4 = 16, 200
    x4 = jax.nn.log_softmax(jax.random.normal(k5, (N4, V4), jnp.float32), axis=-1)
    t4 = jax.random.randint(k6, (N4,), 0, V4, dtype=jnp.int32).at[0].set(padding_idx)
    check(x4, t4, block_bytes=4096)

    print("KERNEL_OK")
</pallas_src>

<mosaic_0001>
module attributes {stable_mosaic.version = 11 : i64} {
  func.func @_label_smoothing_kernel(%arg0: i32, %arg1: i32, %arg2: memref<16x32xf32, #tpu.memory_space<vmem>>, %arg3: memref<16x1xi32, #tpu.memory_space<vmem>>, %arg4: memref<1x1x128xf32, #tpu.memory_space<vmem>>, %arg5: memref<16x1xf32, #tpu.memory_space<vmem>>) attributes {dimension_semantics = [#tpu.dimension_semantics<parallel>, #tpu.dimension_semantics<arbitrary>], iteration_bounds = array<i64: 1, 1>, scalar_prefetch = 0 : i64, scratch_operands = 1 : i64, tpu.core_type = #tpu.core_type<tc>, window_params = [{transform_indices = @transform_0, window_bounds = array<i64: 16, 32>}, {transform_indices = @transform_1, window_bounds = array<i64: 16, 1>}, {transform_indices = @transform_2, window_bounds = array<i64: 1, 1, 128>}]} {
    %c0_i32 = arith.constant 0 : i32
    %0 = arith.cmpi eq, %arg1, %c0_i32 : i32
    %1 = arith.extui %0 : i1 to i32
    %c0_i32_0 = arith.constant 0 : i32
    %2 = arith.cmpi ne, %1, %c0_i32_0 : i32
    scf.if %2 {
      %cst_17 = arith.constant 0.000000e+00 : f32
      %33 = vector.broadcast %cst_17 : f32 to vector<16x1xf32>
      %c0_18 = arith.constant 0 : index
      %c0_19 = arith.constant 0 : index
      %34 = vector.load %arg5[%c0_18, %c0_19] : memref<16x1xf32, #tpu.memory_space<vmem>>, vector<16x1xf32>
      tpu.vector_store %arg5[%c0_18, %c0_19], %33 {strides = array<i32>} : memref<16x1xf32, #tpu.memory_space<vmem>>, vector<16x1xf32>,
    } else {
    }
    %c0 = arith.constant 0 : index
    %c0_1 = arith.constant 0 : index
    %3 = vector.load %arg2[%c0, %c0_1] : memref<16x32xf32, #tpu.memory_space<vmem>>, vector<16x32xf32>
    %c0_2 = arith.constant 0 : index
    %c0_3 = arith.constant 0 : index
    %4 = vector.load %arg3[%c0_2, %c0_3] : memref<16x1xi32, #tpu.memory_space<vmem>>, vector<16x1xi32>
    %5 = tpu.iota {dimensions = array<i32: 1>} : vector<1x32xi32>
    %c0_i32_4 = arith.constant 0 : i32
    %6 = vector.broadcast %c0_i32_4 : i32 to vector<1x32xi32>
    %7 = arith.addi %6, %5 : vector<1x32xi32>
    %8 = tpu.iota {dimensions = array<i32: 0>} : vector<32x1xi32>
    %c0_i32_5 = arith.constant 0 : i32
    %9 = vector.broadcast %c0_i32_5 : i32 to vector<32x1xi32>
    %10 = arith.addi %9, %8 : vector<32x1xi32>
    %c0_i32_6 = arith.constant 0 : i32
    %11 = vector.broadcast %c0_i32_6 : i32 to vector<32x1xi32>
    %12 = arith.cmpi ne, %10, %11 : vector<32x1xi32>
    %13 = arith.extui %12 : vector<32x1xi1> to vector<32x1xi32>
    %14 = arith.sitofp %13 : vector<32x1xi32> to vector<32x1xf32>
    %15 = vector.broadcast %7 : vector<1x32xi32> to vector<16x32xi32>
    %16 = vector.broadcast %4 : vector<16x1xi32> to vector<16x32xi32>
    %17 = arith.cmpi eq, %15, %16 : vector<16x32xi32>
    %cst = arith.constant dense<0.000000e+00> : vector<16x1xf32>
    %18 = tpu.matmul %3, %14, %cst {dimension_numbers = #tpu.dot_dimension_numbers<[1], [0], [0], [1], [0, 0, 1, 1], [], []>} : vector<16x32xf32>, vector<32x1xf32>, vector<16x1xf32> -> vector<16x1xf32>
    %cst_7 = arith.constant 0.000000e+00 : f32
    %19 = vector.broadcast %cst_7 : f32 to vector<16x32xf32>
    %20 = arith.select %17, %3, %19 : vector<16x32xi1>, vector<16x32xf32>
    %cst_8 = arith.constant dense<0.000000e+00> : vector<16x1xf32>
    %21 = tpu.matmul %20, %14, %cst_8 {dimension_numbers = #tpu.dot_dimension_numbers<[1], [0], [0], [1], [0, 0, 1, 1], [], []>} : vector<16x32xf32>, vector<32x1xf32>, vector<16x1xf32> -> vector<16x1xf32>
    %c0_9 = arith.constant 0 : index
    %c0_10 = arith.constant 0 : index
    %22 = vector.load %arg5[%c0_9, %c0_10] : memref<16x1xf32, #tpu.memory_space<vmem>>, vector<16x1xf32>
    %cst_11 = arith.constant -0.00333333341 : f32
    %23 = vector.broadcast %cst_11 : f32 to vector<16x1xf32>
    %24 = arith.mulf %23, %18 : vector<16x1xf32>
    %cst_12 = arith.constant 0.896666646 : f32
    %25 = vector.broadcast %cst_12 : f32 to vector<16x1xf32>
    %26 = arith.mulf %25, %21 : vector<16x1xf32>
    %27 = arith.subf %24, %26 : vector<16x1xf32>
    %28 = arith.addf %22, %27 : vector<16x1xf32>
    %c0_13 = arith.constant 0 : index
    %c0_14 = arith.constant 0 : index
    %29 = vector.load %arg5[%c0_13, %c0_14] : memref<16x1xf32, #tpu.memory_space<vmem>>, vector<16x1xf32>
    tpu.vector_store %arg5[%c0_13, %c0_14], %28 {strides = array<i32>} : memref<16x1xf32, #tpu.memory_space<vmem>>, vector<16x1xf32>,
    %c0_i32_15 = arith.constant 0 : i32
    %30 = arith.cmpi eq, %arg1, %c0_i32_15 : i32
    %31 = arith.extui %30 : i1 to i32
    %c0_i32_16 = arith.constant 0 : i32
    %32 = arith.cmpi ne, %31, %c0_i32_16 : i32
    scf.if %32 {
      %c0_i32_17 = arith.constant 0 : i32
      %33 = vector.broadcast %c0_i32_17 : i32 to vector<16x1xi32>
      %34 = arith.cmpi ne, %4, %33 : vector<16x1xi32>
      %c0_18 = arith.constant 0 : index
      %c0_19 = arith.constant 0 : index
      %35 = vector.load %arg5[%c0_18, %c0_19] : memref<16x1xf32, #tpu.memory_space<vmem>>, vector<16x1xf32>
      %cst_20 = arith.constant -0.665202737 : f32
      %36 = vector.broadcast %cst_20 : f32 to vector<16x1xf32>
      %37 = arith.addf %35, %36 : vector<16x1xf32>
      %cst_21 = arith.constant 0.000000e+00 : f32
      %38 = vector.broadcast %cst_21 : f32 to vector<16x1xf32>
      %39 = arith.select %34, %37, %38 : vector<16x1xi1>, vector<16x1xf32>
      %cst_22 = arith.constant 0.000000e+00 : f32
      %40 = vector.broadcast %cst_22 : f32 to vector<1x1x128xf32>
      %41 = vector.shape_cast %39 : vector<16x1xf32> to vector<1x16x1xf32>
      %cst_23 = arith.constant dense<0.000000e+00> : vector<1xf32>
      %42 = vector.multi_reduction <add>, %41, %cst_23 [1, 2] : vector<1x16x1xf32> to vector<1xf32>
      %43 = vector.shape_cast %42 : vector<1xf32> to vector<1x1x1xf32>
      %44 = vector.extract %43[0, 0, 0] : f32 from vector<1x1x1xf32>
      %45 = vector.broadcast %44 : f32 to vector<1x1x128xf32>
      %46 = arith.addf %40, %45 : vector<1x1x128xf32>
      %c0_24 = arith.constant 0 : index
      %c0_25 = arith.constant 0 : index
      %c0_26 = arith.constant 0 : index
      %47 = vector.load %arg4[%c0_24, %c0_25, %c0_26] : memref<1x1x128xf32, #tpu.memory_space<vmem>>, vector<1x1x128xf32>
      tpu.vector_store %arg4[%c0_24, %c0_25, %c0_26], %46 {strides = array<i32>} : memref<1x1x128xf32, #tpu.memory_space<vmem>>, vector<1x1x128xf32>,
    } else {
    }
    return
  }
  func.func @transform_0(%arg0: i32, %arg1: i32) -> (i32, i32) {
    %c0_i32 = arith.constant 0 : i32
    return %arg0, %arg1 : i32, i32
  }
  func.func @transform_1(%arg0: i32, %arg1: i32) -> (i32, i32) {
    %c0_i32 = arith.constant 0 : i32
    %c0_i32_0 = arith.constant 0 : i32
    return %arg0, %c0_i32 : i32, i32
  }
  func.func @transform_2(%arg0: i32, %arg1: i32) -> (i32, i32, i32) {
    %c0_i32 = arith.constant 0 : i32
    %c0_i32_0 = arith.constant 0 : i32
    %c0_i32_1 = arith.constant 0 : i32
    return %arg0, %c0_i32, %c0_i32_0 : i32, i32, i32
  }
}

</mosaic_0001>

<bundles_post_ra>
// kernel: tpu_custom_call.1
= control target key start
LH: loop header
LB: loop body
LE: loop exit
PB: predicated region body
PF: predicated region fallthrough
CT: control target
= control target key end

     0   :  { %v23_v1 = vlaneseq  ;;  %v338_v2 = vmov 0   ;;  %v339_v3 = vmov 1.0   ;;  %s390_s0 = inlined_call_operand.vmem [shape: f32[16,32], index: 0, kind: input, shape index: {}]   ;;  %s391_s1 = inlined_call_operand.vmem [shape: s32[16,1], index: 1, kind: input, shape index: {}]   ;;  %s392_s2 = inlined_call_operand.hbm [shape: f32[1,1,128], index: 2, kind: output, shape index: {}]  }
   0x1   :  { %v360_v0 = vld [vmem:[%s391_s1] sm:$0xff]  ;;  %315 = vset.pattern.permute.xlu0 %v338_v2  ;;  %287 = vmatprep.subr.mxu0 %v339_v3 }
   0x2   :  { %7 = vsyncpa [#allocation4], 0  ;;  %43 = vperm.xlu0 %315, %v360_v0   ;;  %288 = vmatpush3.msra.mxu0 %v339_v3  ;;  %v26_v4 = vshrl.u32 %v23_v1, 7  ;;  %v22_v5 = vld [vmem:[%s391_s1 + $0x8] sm:$0xff]  ;;  %vm50_vm1 = vcmask 261120   ;;  %v19_v7 = vld [vmem:[%s390_s0] sm:$0xff] }
   0x3   :  { %289 = vmatprep.subr.mxu0 %v339_v3  ;;  %298 = vmatprep.subr.mxu1 %v339_v3  ;;  %v20_v6 = vld [vmem:[%s390_s0 + $0x8] sm:$0xff]  ;;  %vm16_vm2 = vcmask 7168   ;;  %v340_v8 = vmov 0.0   ;;  %v24_v9 = vand.u32 127, %v23_v1  ;;  %vm232_vm5 = vcmp.ne.s32.totalorder %v22_v5, 0  ;;  %s341_s0 = smov [#allocation3]  }
   0x4   :  { %290 = vmatpush3.msra.mxu0 %v339_v3  ;;  %299 = vmatpush3.msra.mxu1 %v339_v3  ;;  %vm30_vm0 = vcmp.ne.s32.totalorder %v26_v4, 0  ;;  %18 = vst.msk [vmem:[#allocation2 + $0x8] sm:$0xff] %vm16_vm2, %v340_v8  ;;  %17 = vst.msk [vmem:[#allocation2] sm:$0xff] %vm16_vm2, %v340_v8  ;;  %vm231_vm6 = vcmp.ne.s32.totalorder %v360_v0, 0  ;;  %s260_s16 = sshll.u32 %s341_s0, 4  ;;  %s261_s16 = int_to_ptr.vmem [resolvable:$true] %s260_s16 }
   0x5   :  { %291 = vmatprep.subr.mxu0 %v339_v3  ;;  %300 = vmatprep.subr.mxu1 %v339_v3  ;;  %s316_s18 = scalar_lea.vmem %s261_s16, 16  ;;  %s320_s19 = scalar_lea.vmem %s261_s16, 32 }
   0x6   :  { %46 = vperm.xlu0 %315, %v22_v5   ;;  %292 = vmatpush3.msra.mxu0 %v339_v3  ;;  %p317_p0 = scmp.ne.s32.totalorder %s261_s16, %s316_s18  ;;  %p321_p1 = scmp.lt.s32.totalorder %s261_s16, %s261_s16 }
   0x7   :  { %301 = vmatpush3.msra.mxu1 %v339_v3  ;;  %293 = vmatprep.subr.msk.mxu0 %vm30_vm0, %v339_v3  ;;  %p322_p2 = scmp.lt.s32.totalorder %s320_s19, %s316_s18 }
   0x8   :  { %302 = vmatprep.subr.mxu1 %v339_v3  ;;  %294 = vmatpush3.msk.msra.mxu0 %vm30_vm0, %v339_v3 }
   0x9   :  { %303 = vmatpush3.msra.mxu1 %v339_v3  ;;  %295 = vmatprep.mubr.msk.f32.mxu0 %vm50_vm1, %v19_v7  ;;  %p323_p3 = por %p322_p2, %p321_p1 }
   0xa   :  { %296 = vmatmul.mubr.msk.f32.vlgmr.msra.gmra.mxu0 %vm50_vm1, %v20_v6  ;;  %304 = vmatprep.subr.msk.mxu1 %vm30_vm0, %v339_v3 }
   0xb   :  { %305 = vmatpush3.msk.msra.mxu1 %vm30_vm0, %v339_v3  ;;  %v216_v19 = vld [vmem:[#allocation2 + $0x8] sm:$0xff]  ;;  %v215_v24 = vld [vmem:[#allocation2] sm:$0xff]  ;;  %p324_p4 = pnand %p323_p3, %p317_p0 }
  0x7d   :  { %v44_v10 = vpop.permute.xlu0 %43 }
  0x7e   :  { %vm48_vm3 = vcmp.eq.s32.totalorder %v24_v9, %v44_v10 }
  0x7f   :  { %v132_v11 = vsel %vm48_vm3, %v19_v7, 0.0 }
  0x80   :  { %306 = vmatprep.mubr.msk.f32.mxu1 %vm50_vm1, %v132_v11 }
  0x81   :  { %v47_v12 = vpop.permute.xlu0 %46 }
  0x82   :  { %vm49_vm4 = vcmp.eq.s32.totalorder %v24_v9, %v47_v12 }
  0x83   :  { %v133_v13 = vsel %vm49_vm4, %v20_v6, 0.0 }
  0x84   :  { %307 = vmatmul.mubr.msk.f32.vlgmr.msra.gmra.mxu1 %vm50_vm1, %v133_v13 }
  0xca   :  { %v297_v14 = vpop.f32.mrf.mxu0 }
  0xcb   :  { %v218_v15 = vmul.f32 -0.0033333334, %v297_v14 }
  0xcc   :  { %v123_v16 = vpop.f32.mrf.mxu0 }
  0xcd   :  { %v217_v21 = vmul.f32 -0.0033333334, %v123_v16 }
 0x144   :  { %v308_v17 = vpop.f32.mrf.mxu1 }
 0x145   :  { %v220_v18 = vmul.f32 0.89666665, %v308_v17 }
 0x146   :  { %v206_v20 = vpop.f32.mrf.mxu1 }
 0x147   :  { %v222_v22 = vsub.f32 %v218_v15, %v220_v18  ;;  %v219_v23 = vmul.f32 0.89666665, %v206_v20 }
 0x149   :  { %v224_v25 = vadd.f32 %v222_v22, %v216_v19  ;;  %v221_v26 = vsub.f32 %v217_v21, %v219_v23 }
 0x14b   :  { %227 = vst.msk [vmem:[#allocation2 + $0x8] sm:$0xff] %vm16_vm2, %v224_v25  ;;  %v223_v27 = vadd.f32 %v221_v26, %v215_v24 }
 0x14d   :  { %226 = vst.msk [vmem:[#allocation2] sm:$0xff] %vm16_vm2, %v223_v27 }
 0x152   :  { %v234_v28 = vld [vmem:[#allocation2 + $0x8] sm:$0xff] }
 0x153   :  { %v236_v29 = vadd.f32 -0.66520274, %v234_v28 }
 0x154   :  { %v233_v30 = vld [vmem:[#allocation2] sm:$0xff] }
 0x155   :  { %v235_v31 = vadd.f32 -0.66520274, %v233_v30  ;;  %v238_v32 = vsel %vm232_vm5, %v236_v29, 0.0 }
 0x156   :  { %v240_v35 = vsel %vm16_vm2, %v238_v32, 0.0 }
 0x157   :  { %v237_v33 = vsel %vm231_vm6, %v235_v31, 0.0 }
 0x158   :  { %v239_v34 = vsel %vm16_vm2, %v237_v33, 0.0 }
 0x159   :  { %v241_v36 = vadd.f32 %v240_v35, %v239_v34 }
 0x15b   :  { %242 = vadd.xlane.f32.xlu1 %v241_v36 }
 0x1e4   :  { %v243_v37 = vpop.xlane.xlu1 %242 }
 0x1e5   :  { %v244_v38 = vrot.slane %v243_v37, 4 }
 0x1e7   :  { %v245_v39 = vadd.f32 %v244_v38, %v243_v37 }
 0x1e9   :  { %v246_v40 = vrot.slane %v245_v39, 2 }
 0x1eb   :  { %v247_v41 = vadd.f32 %v246_v40, %v245_v39 }
 0x1ed   :  { %v248_v42 = vrot.slane %v247_v41, 1 }
 0x1ef   :  { %v249_v43 = vadd.f32 %v248_v42, %v247_v41 }
 0x1f1   :  { %309 = vpush %v249_v43 }
 0x222   :  { %s310_s17 = spop %309 }
 0x223   :  { %v251_v44 = vstv %s310_s17 }
 0x224   :  { %253 = vst [vmem:[#allocation3] sm:$0x1] %v251_v44 }
 0x225   :  { %327 = shalt.err (!%p324_p4)
}
 0x226   :  { %263 = dma.vmem_to_hbm [thread:$0]  %s261_s16, 16, %s392_s2, [#allocation4]  }
 0x227   :  { %336 = dma.done.wait [#allocation4], 16  }
 0x228   :  { %337 = vsyncadd [#allocation4], 4294967280 }
 0x229   :  { %267 = vsyncpa [#allocation4], 1 }

</bundles_post_ra>
